<compile_context>
chip_gen: v7x
topology: tpu7x:2x2x1
jax: 0.10.0
libtpu: 0.0.40
codegen_flags: <defaults>
</compile_context>

<pallas_src>
import jax
import jax.numpy as jnp
from jax.experimental import pallas as pl
from jax.experimental.pallas import tpu as pltpu


def _round_up(x, m):
    return ((x + m - 1) // m) * m


def _mlp_kernel(x_ref, w1_ref, b1_ref, w2_ref, b2_ref, o_ref):
    # Layer 1 on the MXU; f32 accumulation regardless of the input dtype.
    h = jnp.dot(x_ref[...], w1_ref[...], preferred_element_type=jnp.float32)
    # f32 epilogue (bias + ReLU) -- safe on v5e (no bf16 VPU path).
    h = jnp.maximum(h + b1_ref[...], 0.0)                       # [tb_p, P*H] f32
    # Layer 2: block-diagonal [P*H, P] weight on the MXU; output lane g is the
    # scalar prediction for packed row g.
    o = jnp.dot(h, w2_ref[...], preferred_element_type=jnp.float32)  # [tb_p, P]
    o = o + b2_ref[0]                                            # scalar bias (SMEM)
    # TODO(synk): a fully lane-dense (1, tb_p*P) output row would avoid the
    # remaining masked vst on the P-lane store; (B/P, P) already makes the HBM
    # writeback contiguous and reshapes back to (B, 1) for free.
    o_ref[...] = o.astype(o_ref.dtype)


def net_forward(x, w1, b1, w2, b2, *, block_b=32768, input_dtype=None,
                vmem_budget_bytes=24 * 1024 * 1024):
    """Fused MLP forward: relu(x @ w1 + b1) @ w2 + b2.

    x:  [B, F]
    w1: [F, H];  b1: [H] or [1, H]
    w2: [H, 1] (PyTorch predict.weight.T) or any shape with H elements
    b2: scalar-like
    Returns [B, 1] in x's dtype.

    block_b:      batch rows per grid step (double-buffered; capped against a
                  VMEM budget that fits v7x's scoped limit).
    input_dtype:  optional cast of x fed to the MXU.  Prefer feeding x already
                  in the target dtype (e.g. bf16) from the producer -- a
                  wrapper-side cast costs a full extra pass over x.
    """
    B, F = x.shape
    H = w1.shape[1]
    out_dtype = x.dtype

    if input_dtype is not None and x.dtype != input_dtype:
        x = x.astype(input_dtype)          # NOTE: extra HBM read+write pass over x.
    compute_dtype = x.dtype

    # ---- lane packing: P batch rows per 128-lane row ------------------------
    P = 1
    if 0 < F <= 128 and 0 < H <= 128:
        p_max = min(128 // F, 128 // H)
        for p in range(p_max, 0, -1):
            if B % p == 0:                 # packed reshape must be exact
                P = p
                break
    Bp, Kp, Hp = B // P, P * F, P * H

    x_p = x.reshape(Bp, Kp)                # free (contiguous) reshape, no copy
    eye = jnp.eye(P, dtype=jnp.float32)
    w1_bd = jnp.kron(eye, w1.astype(jnp.float32)).astype(compute_dtype)     # [Kp, Hp]
    b1_row = jnp.tile(jnp.reshape(b1, (1, H)).astype(jnp.float32), (1, P))  # [1, Hp]
    w2_bd = jnp.kron(eye, jnp.reshape(w2, (H, 1)).astype(jnp.float32))      # [Hp, P]
    b2_flat = jnp.reshape(b2, (1,)).astype(jnp.float32)                     # SMEM scalar

    # ---- batch tiling (packed rows), budgeted against VMEM ------------------
    itemsize = jnp.dtype(compute_dtype).itemsize
    lane_k = _round_up(Kp, 128)            # VMEM tiles are lane-padded to 128
    lane_h = _round_up(Hp, 128)
    lane_o = _round_up(P, 128)

    tb_p = max(8, _round_up(max(1, block_b // P), 8))

    def _tile_bytes(t):
        return (2 * t * lane_k * itemsize      # x tile, double-buffered
                + t * lane_h * 4               # f32 hidden intermediate
                + 2 * t * lane_o * 4)          # output tile, double-buffered

    while tb_p > 8 and _tile_bytes(tb_p) > vmem_budget_bytes:
        tb_p = max(8, _round_up(tb_p // 2, 8))
    if Bp <= tb_p:
        tb_p = Bp                              # single full-extent block (always legal)
    grid = (pl.cdiv(Bp, tb_p),)                # ragged final block handled by Pallas

    cost = pl.CostEstimate(
        flops=2 * B * F * H + 2 * B * H,
        transcendentals=0,
        bytes_accessed=(B * F * itemsize + B * 4
                        + Kp * Hp * itemsize + 4 * Hp + 4 * Hp * P + 4),
    )

    out_p = pl.pallas_call(
        _mlp_kernel,
        out_shape=jax.ShapeDtypeStruct((Bp, P), out_dtype),
        grid=grid,
        in_specs=[
            pl.BlockSpec((tb_p, Kp), lambda i: (i, 0)),          # x: streamed per tile
            pl.BlockSpec((Kp, Hp), lambda i: (0, 0)),            # w1 block-diag: resident
            pl.BlockSpec((1, Hp), lambda i: (0, 0)),             # b1 (tiled): resident
            pl.BlockSpec((Hp, P), lambda i: (0, 0)),             # w2 block-diag: resident
            pl.BlockSpec(memory_space=pltpu.MemorySpace.SMEM),   # b2: scalar in SMEM
        ],
        out_specs=pl.BlockSpec((tb_p, P), lambda i: (i, 0)),
        compiler_params=pltpu.CompilerParams(
            dimension_semantics=("parallel",),   # batch tiles shard over v7x's 2 TCs
            vmem_limit_bytes=48 * 1024 * 1024,   # headroom for big tiles, < v7x physical
        ),
        cost_estimate=cost,
    )(x_p, w1_bd, b1_row, w2_bd, b2_flat)

    return out_p.reshape(B, 1)                 # free (contiguous) reshape


if __name__ == "__main__":
    n_feature, n_hidden = 32, 32

    key = jax.random.PRNGKey(0)
    kx, kw1, kb1, kw2, kb2 = jax.random.split(key, 5)

    # Deterministic parameter init (mimics torch.nn.Linear uniform bounds).
    bound1 = 1.0 / (n_feature ** 0.5)
    w1 = jax.random.uniform(kw1, (n_feature, n_hidden), jnp.float32, -bound1, bound1)
    b1 = jax.random.uniform(kb1, (n_hidden,), jnp.float32, -bound1, bound1)
    bound2 = 1.0 / (n_hidden ** 0.5)
    w2 = jax.random.uniform(kw2, (n_hidden, 1), jnp.float32, -bound2, bound2)
    b2 = jax.random.uniform(kb2, (1,), jnp.float32, -bound2, bound2)

    def ref_fn(xx):
        xx = xx.astype(jnp.float32)
        return jnp.maximum(xx @ w1 + b1[None, :], 0.0) @ w2 + b2[None, :]

    # Case 1: tiny batch -> single full-extent tile, f32, lane-packed (P=4).
    x_small = jax.random.normal(kx, (8, n_feature), dtype=jnp.float32)
    out = jax.block_until_ready(net_forward(x_small, w1, b1, w2, b2))
    assert out.shape == (8, 1)
    assert jnp.allclose(out, ref_fn(x_small), atol=1e-5, rtol=1e-5)

    # Case 2: multi-tile grid with a ragged final block (no wrapper pad), f32.
    x_big = jax.random.normal(kx, (200, n_feature), dtype=jnp.float32)
    out = jax.block_until_ready(net_forward(x_big, w1, b1, w2, b2, block_b=64))
    assert out.shape == (200, 1)
    assert jnp.allclose(out, ref_fn(x_big), atol=1e-5, rtol=1e-5)

    # Case 3: x arrives as bf16 -> bf16 MXU path by default (f32 accumulate +
    # f32 epilogue), no wrapper-side cast inside net_forward.
    x_bf16 = x_big.astype(jnp.bfloat16)
    out_bf = jax.block_until_ready(net_forward(x_bf16, w1, b1, w2, b2, block_b=64))
    assert out_bf.shape == (200, 1)
    assert jnp.allclose(out_bf.astype(jnp.float32), ref_fn(x_big), atol=1e-1, rtol=1e-1)

    print("KERNEL_OK")
</pallas_src>

<mosaic_0001>
module attributes {stable_mosaic.version = 11 : i64} {
  func.func @_mlp_kernel(%arg0: i32, %arg1: memref<2x128xf32, #tpu.memory_space<vmem>>, %arg2: memref<128x128xf32, #tpu.memory_space<vmem>>, %arg3: memref<1x128xf32, #tpu.memory_space<vmem>>, %arg4: memref<128x4xf32, #tpu.memory_space<vmem>>, %arg5: memref<1xf32, #tpu.memory_space<smem>>, %arg6: memref<2x4xf32, #tpu.memory_space<vmem>>) attributes {dimension_semantics = [#tpu.dimension_semantics<parallel>], iteration_bounds = array<i64: 1>, scalar_prefetch = 0 : i64, scratch_operands = 0 : i64, tpu.core_type = #tpu.core_type<tc>, window_params = [{transform_indices = @transform_0, window_bounds = array<i64: 2, 128>}, {pipeline_mode = #tpu.pipeline_mode<synchronous>, transform_indices = @transform_1, window_bounds = array<i64: 128, 128>}, {pipeline_mode = #tpu.pipeline_mode<synchronous>, transform_indices = @transform_2, window_bounds = array<i64: 1, 128>}, {pipeline_mode = #tpu.pipeline_mode<synchronous>, transform_indices = @transform_3, window_bounds = array<i64: 128, 4>}, {transform_indices = @transform_4, window_bounds = array<i64: 1>}, {transform_indices = @transform_5, window_bounds = array<i64: 2, 4>}]} {
    %c0 = arith.constant 0 : index
    %c0_0 = arith.constant 0 : index
    %0 = vector.load %arg1[%c0, %c0_0] : memref<2x128xf32, #tpu.memory_space<vmem>>, vector<2x128xf32>
    %c0_1 = arith.constant 0 : index
    %c0_2 = arith.constant 0 : index
    %1 = vector.load %arg2[%c0_1, %c0_2] : memref<128x128xf32, #tpu.memory_space<vmem>>, vector<128x128xf32>
    %cst = arith.constant dense<0.000000e+00> : vector<2x128xf32>
    %2 = tpu.matmul %0, %1, %cst {dimension_numbers = #tpu.dot_dimension_numbers<[1], [0], [0], [1], [0, 0, 1, 1], [], []>} : vector<2x128xf32>, vector<128x128xf32>, vector<2x128xf32> -> vector<2x128xf32>
    %c0_3 = arith.constant 0 : index
    %c0_4 = arith.constant 0 : index
    %3 = vector.load %arg3[%c0_3, %c0_4] : memref<1x128xf32, #tpu.memory_space<vmem>>, vector<1x128xf32>
    %4 = vector.broadcast %3 : vector<1x128xf32> to vector<2x128xf32>
    %5 = arith.addf %2, %4 : vector<2x128xf32>
    %cst_5 = arith.constant 0.000000e+00 : f32
    %6 = vector.broadcast %cst_5 : f32 to vector<2x128xf32>
    %7 = arith.maximumf %5, %6 : vector<2x128xf32>
    %c0_6 = arith.constant 0 : index
    %c0_7 = arith.constant 0 : index
    %8 = vector.load %arg4[%c0_6, %c0_7] : memref<128x4xf32, #tpu.memory_space<vmem>>, vector<128x4xf32>
    %cst_8 = arith.constant dense<0.000000e+00> : vector<2x4xf32>
    %9 = tpu.matmul %7, %8, %cst_8 {dimension_numbers = #tpu.dot_dimension_numbers<[1], [0], [0], [1], [0, 0, 1, 1], [], []>} : vector<2x128xf32>, vector<128x4xf32>, vector<2x4xf32> -> vector<2x4xf32>
    %c0_9 = arith.constant 0 : index
    %10 = memref.load %arg5[%c0_9] : memref<1xf32, #tpu.memory_space<smem>>
    %11 = vector.broadcast %10 : f32 to vector<2x4xf32>
    %12 = arith.addf %9, %11 : vector<2x4xf32>
    %c0_10 = arith.constant 0 : index
    %c0_11 = arith.constant 0 : index
    %13 = vector.load %arg6[%c0_10, %c0_11] : memref<2x4xf32, #tpu.memory_space<vmem>>, vector<2x4xf32>
    tpu.vector_store %arg6[%c0_10, %c0_11], %12 {strides = array<i32>} : memref<2x4xf32, #tpu.memory_space<vmem>>, vector<2x4xf32>,
    return
  }
  func.func @transform_0(%arg0: i32) -> (i32, i32) {
    %c0_i32 = arith.constant 0 : i32
    %c0_i32_0 = arith.constant 0 : i32
    return %arg0, %c0_i32 : i32, i32
  }
  func.func @transform_1(%arg0: i32) -> (i32, i32) {
    %c0_i32 = arith.constant 0 : i32
    %c0_i32_0 = arith.constant 0 : i32
    %c0_i32_1 = arith.constant 0 : i32
    return %c0_i32, %c0_i32_0 : i32, i32
  }
  func.func @transform_2(%arg0: i32) -> (i32, i32) {
    %c0_i32 = arith.constant 0 : i32
    %c0_i32_0 = arith.constant 0 : i32
    %c0_i32_1 = arith.constant 0 : i32
    return %c0_i32, %c0_i32_0 : i32, i32
  }
  func.func @transform_3(%arg0: i32) -> (i32, i32) {
    %c0_i32 = arith.constant 0 : i32
    %c0_i32_0 = arith.constant 0 : i32
    %c0_i32_1 = arith.constant 0 : i32
    return %c0_i32, %c0_i32_0 : i32, i32
  }
  func.func @transform_4(%arg0: i32) -> i32 {
    %c0_i32 = arith.constant 0 : i32
    %c0_i32_0 = arith.constant 0 : i32
    return %c0_i32 : i32
  }
  func.func @transform_5(%arg0: i32) -> (i32, i32) {
    %c0_i32 = arith.constant 0 : i32
    %c0_i32_0 = arith.constant 0 : i32
    return %arg0, %c0_i32 : i32, i32
  }
}

</mosaic_0001>

<bundles_post_ra>
// kernel: tpu_custom_call.1
= control target key start
LH: loop header
LB: loop body
LE: loop exit
PB: predicated region body
PF: predicated region fallthrough
CT: control target
= control target key end

     0   :  { %v402_v3 = vmov 0.0|0.0   ;;  %vm403_vm0 = vmmov 0   ;;  %v404_v6 = vmov 0.0   ;;  %s569_s0 = inlined_call_operand.vmem [shape: f32[2,128], index: 0, kind: input, shape index: {}]   ;;  %s570_s1 = inlined_call_operand.vmem [shape: f32[128,128], index: 1, kind: input, shape index: {}]   ;;  %s571_s2 = inlined_call_operand.vmem [shape: f32[1,128], index: 2, kind: input, shape index: {}]   ;;  %s572_s3 = inlined_call_operand.vmem [shape: f32[128,4], index: 3, kind: input, shape index: {}]   ;;  %s573_s4 = inlined_call_operand.<no memory space> [shape: f32[1], index: 4, kind: input, shape index: {}]   ;;  %s574_s5 = inlined_call_operand.hbm [shape: f32[2,4], index: 5, kind: output, shape index: {}]  }
   0x1   :  { %v23_v0 = vld [vmem:[%s570_s1] sm:$0xff]  ;;  %v24_v1 = vld [vmem:[%s570_s1 + $0x8] sm:$0xff]  ;;  %v25_v2 = vld [vmem:[%s570_s1 + $0x10] sm:$0xff]  ;;  %326 = vmatprep.subr.bf16.mxu0 %v402_v3  ;;  %288 = vmatprep.mubr.msk.f32.mxu0 %vm403_vm0, %v404_v6 }
   0x2   :  { %v327_v4 = vpack.c.bf16 %v24_v1, %v23_v0  ;;  %v26_v5 = vld [vmem:[%s570_s1 + $0x18] sm:$0xff]  ;;  %350 = vmatprep.subr.bf16.mxu1 %v402_v3  ;;  %323 = vmatprep.mubr.msk.f32.mxu1 %vm403_vm0, %v404_v6  ;;  %v27_v8 = vld [vmem:[%s570_s1 + $0x20] sm:$0xff]  ;;  %v28_v9 = vld [vmem:[%s570_s1 + $0x28] sm:$0xff] }
   0x3   :  { %v330_v7 = vpack.c.bf16 %v26_v5, %v25_v2  ;;  %v117_v10 = vld [vmem:[%s572_s3] sm:$0xff]  ;;  %v118_v11 = vld [vmem:[%s572_s3 + $0x8] sm:$0xff]  ;;  %v119_v12 = vld [vmem:[%s572_s3 + $0x10] sm:$0xff]  ;;  %v333_v14 = vpack.c.bf16 %v28_v9, %v27_v8 }
   0x4   :  { %328 = vmatpush3.bf16.msra.mxu0 %v327_v4  ;;  %v120_v13 = vld [vmem:[%s572_s3 + $0x18] sm:$0xff]  ;;  %v351_v15 = vpack.c.bf16 %v118_v11, %v117_v10  ;;  %v29_v16 = vld [vmem:[%s570_s1 + $0x30] sm:$0xff]  ;;  %v121_v19 = vld [vmem:[%s572_s3 + $0x20] sm:$0xff] }
   0x5   :  { %329 = vmatprep.subr.bf16.mxu0 %v402_v3  ;;  %v30_v17 = vld [vmem:[%s570_s1 + $0x38] sm:$0xff]  ;;  %v354_v18 = vpack.c.bf16 %v120_v13, %v119_v12  ;;  %v122_v20 = vld [vmem:[%s572_s3 + $0x28] sm:$0xff] }
   0x6   :  { %352 = vmatpush3.bf16.msra.mxu1 %v351_v15 }
   0x7   :  { %353 = vmatprep.subr.bf16.mxu1 %v402_v3 }
   0x8   :  { %331 = vmatpush3.bf16.msra.mxu0 %v330_v7 }
   0x9   :  { %332 = vmatprep.subr.bf16.mxu0 %v402_v3 }
   0xa   :  { %11 = vsyncpa [#allocation4], 0  ;;  %v336_v21 = vpack.c.bf16 %v30_v17, %v29_v16  ;;  %v31_v22 = vld [vmem:[%s570_s1 + $0x40] sm:$0xff]  ;;  %v32_v23 = vld [vmem:[%s570_s1 + $0x48] sm:$0xff]  ;;  %355 = vmatpush3.bf16.msra.mxu1 %v354_v18  ;;  %v357_v24 = vpack.c.bf16 %v122_v20, %v121_v19  ;;  %v134_v56 = vstv %s573_s4  ;;  %s405_s11 = smov [#allocation3]   ;;  %vm205_vm1 = vcmask 25600  }
   0xb   :  { %356 = vmatprep.subr.bf16.mxu1 %v402_v3  ;;  %v123_v25 = vld [vmem:[%s572_s3 + $0x30] sm:$0xff]  ;;  %v124_v26 = vld [vmem:[%s572_s3 + $0x38] sm:$0xff]  ;;  %v339_v27 = vpack.c.bf16 %v32_v23, %v31_v22  ;;  %v125_v31 = vld [vmem:[%s572_s3 + $0x40] sm:$0xff]  ;;  %s213_s12 = sshll.u32 %s405_s11, 4  ;;  %s214_s12 = int_to_ptr.vmem [resolvable:$true] %s213_s12 }
   0xc   :  { %334 = vmatpush3.bf16.msra.mxu0 %v333_v14  ;;  %v33_v28 = vld [vmem:[%s570_s1 + $0x50] sm:$0xff]  ;;  %v34_v29 = vld [vmem:[%s570_s1 + $0x58] sm:$0xff]  ;;  %v360_v30 = vpack.c.bf16 %v124_v26, %v123_v25  ;;  %v126_v32 = vld [vmem:[%s572_s3 + $0x48] sm:$0xff]  ;;  %p383_p1 = scmp.lt.s32.totalorder %s214_s12, %s214_s12 }
   0xd   :  { %335 = vmatprep.subr.bf16.mxu0 %v402_v3  ;;  %v342_v33 = vpack.c.bf16 %v34_v29, %v33_v28  ;;  %v35_v34 = vld [vmem:[%s570_s1 + $0x60] sm:$0xff]  ;;  %v36_v35 = vld [vmem:[%s570_s1 + $0x68] sm:$0xff]  ;;  %v363_v36 = vpack.c.bf16 %v126_v32, %v125_v31  ;;  %v127_v37 = vld [vmem:[%s572_s3 + $0x50] sm:$0xff] }
   0xe   :  { %358 = vmatpush3.bf16.msra.mxu1 %v357_v24  ;;  %v128_v38 = vld [vmem:[%s572_s3 + $0x58] sm:$0xff]  ;;  %v345_v39 = vpack.c.bf16 %v36_v35, %v35_v34  ;;  %v37_v40 = vld [vmem:[%s570_s1 + $0x70] sm:$0xff]  ;;  %v129_v43 = vld [vmem:[%s572_s3 + $0x60] sm:$0xff] }
   0xf   :  { %359 = vmatprep.subr.bf16.mxu1 %v402_v3  ;;  %v38_v41 = vld [vmem:[%s570_s1 + $0x78] sm:$0xff]  ;;  %v366_v42 = vpack.c.bf16 %v128_v38, %v127_v37  ;;  %v130_v44 = vld [vmem:[%s572_s3 + $0x68] sm:$0xff]  ;;  %v22_v47 = vld [vmem:[%s569_s0] sm:$0x3] }
  0x10   :  { %337 = vmatpush3.bf16.msra.mxu0 %v336_v21  ;;  %v348_v45 = vpack.c.bf16 %v38_v41, %v37_v40  ;;  %v369_v46 = vpack.c.bf16 %v130_v44, %v129_v43  ;;  %v131_v48 = vld [vmem:[%s572_s3 + $0x70] sm:$0xff]  ;;  %v132_v49 = vld [vmem:[%s572_s3 + $0x78] sm:$0xff]  ;;  %v221_v51 = vld [vmem:[%s571_s2] ss:$0 sm:$0xff]  ;;  %s378_s3 = scalar_lea.vmem %s214_s12, 32 }
  0x11   :  { %338 = vmatprep.subr.bf16.mxu0 %v402_v3  ;;  %v372_v50 = vpack.c.bf16 %v132_v49, %v131_v48  ;;  %p379_p0 = scmp.ne.s32.totalorder %s214_s12, %s378_s3  ;;  %p384_p2 = scmp.lt.s32.totalorder %s378_s3, %s378_s3 }
  0x12   :  { %361 = vmatpush3.bf16.msra.mxu1 %v360_v30 }
  0x13   :  { %362 = vmatprep.subr.bf16.mxu1 %v402_v3  ;;  %p385_p3 = por %p384_p2, %p383_p1 }
  0x14   :  { %340 = vmatpush3.bf16.msra.mxu0 %v339_v27 }
  0x15   :  { %341 = vmatprep.subr.bf16.mxu0 %v402_v3  ;;  %p386_p4 = pnand %p385_p3, %p379_p0 }
  0x16   :  { %364 = vmatpush3.bf16.msra.mxu1 %v363_v36 }
  0x17   :  { %365 = vmatprep.subr.bf16.mxu1 %v402_v3 }
  0x18   :  { %343 = vmatpush3.bf16.msra.mxu0 %v342_v33 }
  0x19   :  { %344 = vmatprep.subr.bf16.mxu0 %v402_v3 }
  0x1a   :  { %367 = vmatpush3.bf16.msra.mxu1 %v366_v42 }
  0x1b   :  { %368 = vmatprep.subr.bf16.mxu1 %v402_v3 }
  0x1c   :  { %346 = vmatpush3.bf16.msra.mxu0 %v345_v39 }
  0x1d   :  { %347 = vmatprep.subr.bf16.mxu0 %v402_v3 }
  0x1e   :  { %370 = vmatpush3.bf16.msra.mxu1 %v369_v46 }
  0x1f   :  { %371 = vmatprep.subr.bf16.mxu1 %v402_v3 }
  0x20   :  { %349 = vmatpush3.bf16.msra.mxu0 %v348_v45 }
  0x22   :  { %373 = vmatpush3.bf16.msra.mxu1 %v372_v50 }
  0x23   :  { %289 = vmatmul.mubr.f32.vlgmr.msra.gmra.mrb[0].mxu0 %v22_v47 }
  0xf6   :  { %v112_v52 = vpop.f32.mrb[0].mxu0 }
  0xf7   :  { %v113_v53 = vadd.f32 %v221_v51, %v112_v52  ;;  %v290_v54 = vpop.f32.mrb[1].mxu0 }
  0xf9   :  { %v116_v55 = vmax.f32 %v113_v53, 0.0 }
  0xfb   :  { %324 = vmatmul.mubr.f32.vlgmr.msra.gmra.mrb[0].mxu1 %v116_v55 }
 0x1ce   :  { %v201_v57 = vpop.f32.mrb[0].mxu1 }
 0x1cf   :  { %v202_v58 = vadd.f32 %v201_v57, %v134_v56  ;;  %v325_v59 = vpop.f32.mrb[1].mxu1 }
 0x1d1   :  { %206 = vst.msk [vmem:[#allocation3] sm:$0x3] %vm205_vm1, %v202_v58 }
 0x1d2   :  { %389 = shalt.err (!%p386_p4)
}
 0x1d3   :  { %s390_s14 = scalar_lea.hbm %s574_s5, 32 }
 0x1d4   :  { %p391_p5 = scmp.ne.s32.totalorder %s574_s5, %s390_s14  ;;  %p394_p6 = scmp.lt.u32.totalorder %s390_s14, %s574_s5 }
 0x1d6   :  { %p396_p7 = pnand %p394_p6, %p391_p5 }
 0x1d8   :  { %399 = shalt.err (!%p396_p7)
}
 0x1d9   :  { %216 = dma.vmem_to_hbm [thread:$0]  %s214_s12, 32, %s574_s5, [#allocation4]  }
 0x1da   :  { %400 = dma.done.wait [#allocation4], 32  }
 0x1db   :  { %401 = vsyncadd [#allocation4], 4294967264 }
 0x1dc   :  { %220 = vsyncpa [#allocation4], 1 }

</bundles_post_ra>
